<compile_context>
chip_gen: v5e
topology: v5e:2x2
jax: 0.10.0
libtpu: 0.0.40
codegen_flags: <defaults>
</compile_context>

<pallas_src>
import functools

import jax
import jax.numpy as jnp
from jax.experimental import pallas as pl
from jax.experimental.pallas import tpu as pltpu


def _round_up(n, m):
    return ((n + m - 1) // m) * m


# ---------------------------------------------------------------------------
# Fused MLP kernel: x -> [Linear -> ReLU] * (depth-1) -> Linear
# refs = (x_ref, w0, b0, w1, b1, ..., w_{d-1}, b_{d-1}, o_ref)
# ---------------------------------------------------------------------------
def _mlp_kernel(*refs, depth: int, compute_dtype):
    x_ref = refs[0]
    o_ref = refs[-1]
    wb_refs = refs[1:-1]

    h = x_ref[...]
    if h.dtype != compute_dtype:
        h = h.astype(compute_dtype)

    for i in range(depth):
        w_ref = wb_refs[2 * i]
        b_ref = wb_refs[2 * i + 1]
        # MXU matmul with f32 accumulation.
        acc = jnp.dot(h, w_ref[...], preferred_element_type=jnp.float32)
        acc = acc + b_ref[...]              # [1, Out] broadcast, in f32
        if i < depth - 1:
            acc = jnp.maximum(acc, 0.0)     # ReLU in f32 (v5e has no bf16 VPU)
            h = acc.astype(compute_dtype)   # next layer's input
        else:
            o_ref[...] = acc.astype(o_ref.dtype)


# ---------------------------------------------------------------------------
# One-time parameter preparation (hoisted out of the per-call path)
# ---------------------------------------------------------------------------
def prepare_params(params, compute_dtype=jnp.float32):
    """Cast weights to the compute dtype and reshape biases to (1, out) f32
    rows.  Call once; reuse the result across forward calls."""
    prepped = []
    for w, b in params:
        prepped.append((jnp.asarray(w, compute_dtype),
                        jnp.asarray(b, jnp.float32).reshape(1, -1)))
    return tuple(prepped)


# ---------------------------------------------------------------------------
# Jitted forward wrapper: one fused pallas_call over batch tiles
# ---------------------------------------------------------------------------
@functools.partial(jax.jit,
                   static_argnames=("compute_dtype", "out_dtype", "batch_tile"))
def dnn_forward(prepared, x, *, compute_dtype=jnp.float32,
                out_dtype=jnp.float32, batch_tile=256):
    """Fused MLP forward.

    prepared: output of prepare_params().
    x:        [B, in_features] array.
    """
    depth = len(prepared)
    B, in_features = x.shape
    out_features = prepared[-1][0].shape[1]

    # bf16 packs 16 rows per vreg; f32 packs 8.  Force the batch tile to a
    # multiple of the row alignment (fixes odd user batch_tile values) and
    # aim for >= 2 grid steps so the "parallel" batch axis actually splits
    # across v7x's two TensorCores.
    row_align = 16 if compute_dtype == jnp.bfloat16 else 8
    batch_tile = max(row_align, (batch_tile // row_align) * row_align)
    B_r = _round_up(B, row_align)
    TB = min(batch_tile,
             max(row_align, _round_up(pl.cdiv(B_r, 2), row_align)))
    B_p = _round_up(B, TB)

    # Only the batch dim is padded; feature dims keep their true widths
    # (block last dim == full array dim is legal), minimizing HBM traffic.
    x_c = x.astype(compute_dtype)
    if B_p != B:
        x_c = jnp.pad(x_c, ((0, B_p - B), (0, 0)))

    wb_inputs = []
    in_specs = [pl.BlockSpec((TB, in_features), lambda i: (i, 0))]
    for w, b in prepared:
        w_c = w.astype(compute_dtype)       # no-op if prepared with same dtype
        wb_inputs += [w_c, b]
        # Full, resident weight / bias blocks (same block every grid step).
        in_specs.append(pl.BlockSpec(w_c.shape, lambda i: (0, 0)))
        in_specs.append(pl.BlockSpec(b.shape, lambda i: (0, 0)))
    out_specs = pl.BlockSpec((TB, out_features), lambda i: (i, 0))

    kernel = functools.partial(_mlp_kernel, depth=depth,
                               compute_dtype=compute_dtype)

    out_p = pl.pallas_call(
        kernel,
        out_shape=jax.ShapeDtypeStruct((B_p, out_features), out_dtype),
        grid=(B_p // TB,),
        in_specs=in_specs,
        out_specs=out_specs,
        compiler_params=pltpu.CompilerParams(
            dimension_semantics=("parallel",),
        ),
    )(x_c, *wb_inputs)

    # Slice away batch padding (fused into the jit; no extra dispatch).
    return out_p[:B] if B_p != B else out_p


# ---------------------------------------------------------------------------
# Parameter init (mimics torch.nn.Linear defaults) and plain-JAX reference
# ---------------------------------------------------------------------------
def init_dnn_params(key, layers):
    """uniform(-1/sqrt(fan_in), 1/sqrt(fan_in)) for weight and bias,
    weight stored as [in, out] (transpose of PyTorch's [out, in])."""
    params = []
    for i in range(len(layers) - 1):
        fan_in, fan_out = layers[i], layers[i + 1]
        key, kw, kb = jax.random.split(key, 3)
        bound = 1.0 / jnp.sqrt(fan_in)
        w = jax.random.uniform(kw, (fan_in, fan_out), jnp.float32,
                               minval=-bound, maxval=bound)
        b = jax.random.uniform(kb, (fan_out,), jnp.float32,
                               minval=-bound, maxval=bound)
        params.append((w, b))
    return params


def dnn_forward_ref(params, x):
    depth = len(params)
    out = x
    for i, (w, b) in enumerate(params):
        out = out @ w + b
        if i < depth - 1:
            out = jnp.maximum(out, 0.0)
    return out


if __name__ == "__main__":
    # DNN(layers=[32, 64, 64, 16]): 3 Linear layers, ReLU after the first two.
    layers = [32, 64, 64, 16]
    batch = 8

    key = jax.random.PRNGKey(0)
    key, kx = jax.random.split(key)
    x = jax.random.normal(kx, (batch, layers[0]), jnp.float32)
    params = init_dnn_params(key, layers)

    ref = dnn_forward_ref(params, x)

    # f32 compute path: exact layout handling -> tight tolerance.
    prepped_f32 = prepare_params(params, jnp.float32)
    out = jax.block_until_ready(dnn_forward(prepped_f32, x))
    assert out.shape == (batch, layers[-1])
    assert jnp.allclose(out, ref, atol=1e-4, rtol=1e-4), "f32 mismatch vs reference"

    # bf16 MXU path (full-rate MXU, halved DMA, bf16 output): loose tolerance.
    prepped_bf16 = prepare_params(params, jnp.bfloat16)
    out_bf16 = jax.block_until_ready(
        dnn_forward(prepped_bf16, x, compute_dtype=jnp.bfloat16,
                    out_dtype=jnp.bfloat16))
    assert out_bf16.shape == (batch, layers[-1])
    assert jnp.allclose(out_bf16.astype(jnp.float32), ref,
                        atol=1e-1, rtol=1e-1), "bf16 mismatch vs reference"

    print("KERNEL_OK")
</pallas_src>

<mosaic_0001>
module attributes {stable_mosaic.version = 11 : i64} {
  func.func @_mlp_kernel(%arg0: i32, %arg1: memref<8x32xf32, #tpu.memory_space<vmem>>, %arg2: memref<32x64xf32, #tpu.memory_space<vmem>>, %arg3: memref<1x64xf32, #tpu.memory_space<vmem>>, %arg4: memref<64x64xf32, #tpu.memory_space<vmem>>, %arg5: memref<1x64xf32, #tpu.memory_space<vmem>>, %arg6: memref<64x16xf32, #tpu.memory_space<vmem>>, %arg7: memref<1x16xf32, #tpu.memory_space<vmem>>, %arg8: memref<8x16xf32, #tpu.memory_space<vmem>>) attributes {dimension_semantics = [#tpu.dimension_semantics<parallel>], iteration_bounds = array<i64: 1>, scalar_prefetch = 0 : i64, scratch_operands = 0 : i64, tpu.core_type = #tpu.core_type<tc>, window_params = [{transform_indices = @transform_0, window_bounds = array<i64: 8, 32>}, {pipeline_mode = #tpu.pipeline_mode<synchronous>, transform_indices = @transform_1, window_bounds = array<i64: 32, 64>}, {pipeline_mode = #tpu.pipeline_mode<synchronous>, transform_indices = @transform_2, window_bounds = array<i64: 1, 64>}, {pipeline_mode = #tpu.pipeline_mode<synchronous>, transform_indices = @transform_3, window_bounds = array<i64: 64, 64>}, {pipeline_mode = #tpu.pipeline_mode<synchronous>, transform_indices = @transform_4, window_bounds = array<i64: 1, 64>}, {pipeline_mode = #tpu.pipeline_mode<synchronous>, transform_indices = @transform_5, window_bounds = array<i64: 64, 16>}, {pipeline_mode = #tpu.pipeline_mode<synchronous>, transform_indices = @transform_6, window_bounds = array<i64: 1, 16>}, {transform_indices = @transform_7, window_bounds = array<i64: 8, 16>}]} {
    %c0 = arith.constant 0 : index
    %c0_0 = arith.constant 0 : index
    %0 = vector.load %arg1[%c0, %c0_0] : memref<8x32xf32, #tpu.memory_space<vmem>>, vector<8x32xf32>
    %c0_1 = arith.constant 0 : index
    %c0_2 = arith.constant 0 : index
    %1 = vector.load %arg2[%c0_1, %c0_2] : memref<32x64xf32, #tpu.memory_space<vmem>>, vector<32x64xf32>
    %cst = arith.constant dense<0.000000e+00> : vector<8x64xf32>
    %2 = tpu.matmul %0, %1, %cst {dimension_numbers = #tpu.dot_dimension_numbers<[1], [0], [0], [1], [0, 0, 1, 1], [], []>} : vector<8x32xf32>, vector<32x64xf32>, vector<8x64xf32> -> vector<8x64xf32>
    %c0_3 = arith.constant 0 : index
    %c0_4 = arith.constant 0 : index
    %3 = vector.load %arg3[%c0_3, %c0_4] : memref<1x64xf32, #tpu.memory_space<vmem>>, vector<1x64xf32>
    %4 = vector.broadcast %3 : vector<1x64xf32> to vector<8x64xf32>
    %5 = arith.addf %2, %4 : vector<8x64xf32>
    %cst_5 = arith.constant 0.000000e+00 : f32
    %6 = vector.broadcast %cst_5 : f32 to vector<8x64xf32>
    %7 = arith.maximumf %5, %6 : vector<8x64xf32>
    %c0_6 = arith.constant 0 : index
    %c0_7 = arith.constant 0 : index
    %8 = vector.load %arg4[%c0_6, %c0_7] : memref<64x64xf32, #tpu.memory_space<vmem>>, vector<64x64xf32>
    %cst_8 = arith.constant dense<0.000000e+00> : vector<8x64xf32>
    %9 = tpu.matmul %7, %8, %cst_8 {dimension_numbers = #tpu.dot_dimension_numbers<[1], [0], [0], [1], [0, 0, 1, 1], [], []>} : vector<8x64xf32>, vector<64x64xf32>, vector<8x64xf32> -> vector<8x64xf32>
    %c0_9 = arith.constant 0 : index
    %c0_10 = arith.constant 0 : index
    %10 = vector.load %arg5[%c0_9, %c0_10] : memref<1x64xf32, #tpu.memory_space<vmem>>, vector<1x64xf32>
    %11 = vector.broadcast %10 : vector<1x64xf32> to vector<8x64xf32>
    %12 = arith.addf %9, %11 : vector<8x64xf32>
    %cst_11 = arith.constant 0.000000e+00 : f32
    %13 = vector.broadcast %cst_11 : f32 to vector<8x64xf32>
    %14 = arith.maximumf %12, %13 : vector<8x64xf32>
    %c0_12 = arith.constant 0 : index
    %c0_13 = arith.constant 0 : index
    %15 = vector.load %arg6[%c0_12, %c0_13] : memref<64x16xf32, #tpu.memory_space<vmem>>, vector<64x16xf32>
    %cst_14 = arith.constant dense<0.000000e+00> : vector<8x16xf32>
    %16 = tpu.matmul %14, %15, %cst_14 {dimension_numbers = #tpu.dot_dimension_numbers<[1], [0], [0], [1], [0, 0, 1, 1], [], []>} : vector<8x64xf32>, vector<64x16xf32>, vector<8x16xf32> -> vector<8x16xf32>
    %c0_15 = arith.constant 0 : index
    %c0_16 = arith.constant 0 : index
    %17 = vector.load %arg7[%c0_15, %c0_16] : memref<1x16xf32, #tpu.memory_space<vmem>>, vector<1x16xf32>
    %18 = vector.broadcast %17 : vector<1x16xf32> to vector<8x16xf32>
    %19 = arith.addf %16, %18 : vector<8x16xf32>
    %c0_17 = arith.constant 0 : index
    %c0_18 = arith.constant 0 : index
    %20 = vector.load %arg8[%c0_17, %c0_18] : memref<8x16xf32, #tpu.memory_space<vmem>>, vector<8x16xf32>
    tpu.vector_store %arg8[%c0_17, %c0_18], %19 {strides = array<i32>} : memref<8x16xf32, #tpu.memory_space<vmem>>, vector<8x16xf32>,
    return
  }
  func.func @transform_0(%arg0: i32) -> (i32, i32) {
    %c0_i32 = arith.constant 0 : i32
    %c0_i32_0 = arith.constant 0 : i32
    return %arg0, %c0_i32 : i32, i32
  }
  func.func @transform_1(%arg0: i32) -> (i32, i32) {
    %c0_i32 = arith.constant 0 : i32
    %c0_i32_0 = arith.constant 0 : i32
    %c0_i32_1 = arith.constant 0 : i32
    return %c0_i32, %c0_i32_0 : i32, i32
  }
  func.func @transform_2(%arg0: i32) -> (i32, i32) {
    %c0_i32 = arith.constant 0 : i32
    %c0_i32_0 = arith.constant 0 : i32
    %c0_i32_1 = arith.constant 0 : i32
    return %c0_i32, %c0_i32_0 : i32, i32
  }
  func.func @transform_3(%arg0: i32) -> (i32, i32) {
    %c0_i32 = arith.constant 0 : i32
    %c0_i32_0 = arith.constant 0 : i32
    %c0_i32_1 = arith.constant 0 : i32
    return %c0_i32, %c0_i32_0 : i32, i32
  }
  func.func @transform_4(%arg0: i32) -> (i32, i32) {
    %c0_i32 = arith.constant 0 : i32
    %c0_i32_0 = arith.constant 0 : i32
    %c0_i32_1 = arith.constant 0 : i32
    return %c0_i32, %c0_i32_0 : i32, i32
  }
  func.func @transform_5(%arg0: i32) -> (i32, i32) {
    %c0_i32 = arith.constant 0 : i32
    %c0_i32_0 = arith.constant 0 : i32
    %c0_i32_1 = arith.constant 0 : i32
    return %c0_i32, %c0_i32_0 : i32, i32
  }
  func.func @transform_6(%arg0: i32) -> (i32, i32) {
    %c0_i32 = arith.constant 0 : i32
    %c0_i32_0 = arith.constant 0 : i32
    %c0_i32_1 = arith.constant 0 : i32
    return %c0_i32, %c0_i32_0 : i32, i32
  }
  func.func @transform_7(%arg0: i32) -> (i32, i32) {
    %c0_i32 = arith.constant 0 : i32
    %c0_i32_0 = arith.constant 0 : i32
    return %arg0, %c0_i32 : i32, i32
  }
}

</mosaic_0001>

<bundles_post_ra>
// kernel: dnn_forward.1
= control target key start
LH: loop header
LB: loop body
LE: loop exit
PB: predicated region body
PF: predicated region fallthrough
CT: control target
= control target key end

     0   :  { %12 = vsyncpa [#allocation3], 0  ;;  %s340_s0 = inlined_call_operand.vmem [shape: f32[8,32], index: 0, kind: input, shape index: {}]   ;;  %s341_s1 = inlined_call_operand.hbm [shape: f32[32,64], index: 1, kind: input, shape index: {}]   ;;  %s342_s2 = inlined_call_operand.vmem [shape: f32[1,64], index: 2, kind: input, shape index: {}]   ;;  %s343_s3 = inlined_call_operand.vmem [shape: f32[64,64], index: 3, kind: input, shape index: {}]   ;;  %s344_s4 = inlined_call_operand.vmem [shape: f32[1,64], index: 4, kind: input, shape index: {}]   ;;  %s345_s5 = inlined_call_operand.vmem [shape: f32[64,16], index: 5, kind: input, shape index: {}]   ;;  %s346_s6 = inlined_call_operand.vmem [shape: f32[1,16], index: 6, kind: input, shape index: {}]   ;;  %s347_s7 = inlined_call_operand.hbm [shape: f32[8,16], index: 7, kind: output, shape index: {}]  }
   0x1   :  { %13 = vsyncpa [#allocation4], 0  ;;  %s20_s26 = sshll.u32 %s341_s1, 4  ;;  %s230_s27 = smov [#allocation2]   ;;  %s21_s26 = int_to_ptr.hbm [resolvable:$true] %s20_s26 }
   0x2   :  { %s22_s28 = sshll.u32 %s230_s27, 4  ;;  %s231_s29 = smov 128   ;;  %s23_s28 = int_to_ptr.vmem [resolvable:$true] %s22_s28 }
   0x3   :  { %s232_s30 = smov 8  }
   0x4   :  { %28 = dma.hbm_to_vmem [thread:$0]  %s21_s26, 512, %s23_s28, [#allocation3], %s231_s29, %s231_s29, %s232_s30  }
   0x5   :  { %226 = dma.done.wait [#allocation3], 512  }
   0x6   :  { %227 = vsyncadd [#allocation3], 4294966784  ;;  %v47_v0 = vld [vmem:[#allocation2 + $0x18] sm:$0xff]  ;;  %v46_v1 = vld [vmem:[#allocation2 + $0x10] sm:$0xff]  ;;  %vm52_vm0 = vcmask 261120   ;;  %vm89_vm1 = vcmask 523264  }
   0x7   :  { %68 = vmatpush.msra.mxu0 %v47_v0  ;;  %v84_v2 = vld [vmem:[%s343_s3 + $0x38] sm:$0xff]  ;;  %v45_v3 = vld [vmem:[#allocation2 + $0x8] sm:$0xff]  ;;  %v83_v4 = vld [vmem:[%s343_s3 + $0x30] sm:$0xff]  ;;  %s233_s20 = smov [#allocation5]   ;;  %s158_s23 = sshll.u32 %s347_s7, 4  ;;  %vm149_vm2 = vcmask 130048   ;;  %s159_s23 = int_to_ptr.hbm [resolvable:$true] %s158_s23 }
   0x8   :  { %101 = vmatpush.msra.mxu1 %v84_v2  ;;  %v82_v5 = vld [vmem:[%s343_s3 + $0x28] sm:$0xff]  ;;  %v44_v6 = vld [vmem:[#allocation2] sm:$0xff]  ;;  %v80_v9 = vld [vmem:[%s343_s3 + $0x18] sm:$0xff] }
   0x9   :  { %69 = vmatpush.msra.mxu0 %v46_v1  ;;  %v43_v7 = vld [vmem:[%s340_s0] sm:$0xff]  ;;  %v79_v10 = vld [vmem:[%s343_s3 + $0x10] sm:$0xff]  ;;  %v78_v11 = vld [vmem:[%s343_s3 + $0x8] sm:$0xff]  ;;  %s156_s0 = sshll.u32 %s233_s20, 4  ;;  %s157_s0 = int_to_ptr.vmem [resolvable:$true] %s156_s0 }
   0xa   :  { %102 = vmatpush.msra.mxu1 %v83_v4  ;;  %v81_v8 = vld [vmem:[%s343_s3 + $0x20] sm:$0xff]  ;;  %v121_v13 = vld [vmem:[%s345_s5 + $0x38] sm:$0xff]  ;;  %v120_v14 = vld [vmem:[%s345_s5 + $0x30] sm:$0xff] }
   0xb   :  { %70 = vmatpush.msra.mxu0 %v45_v3  ;;  %v77_v12 = vld [vmem:[%s343_s3] sm:$0xff]  ;;  %137 = vmatpush.msra.mxu2 %v121_v13  ;;  %v119_v15 = vld [vmem:[%s345_s5 + $0x28] sm:$0xff]  ;;  %v117_v17 = vld [vmem:[%s345_s5 + $0x18] sm:$0xff] }
   0xc   :  { %103 = vmatpush.msra.mxu1 %v82_v5  ;;  %v118_v16 = vld [vmem:[%s345_s5 + $0x20] sm:$0xff]  ;;  %v116_v22 = vld [vmem:[%s345_s5 + $0x10] sm:$0xff]  ;;  %v115_v23 = vld [vmem:[%s345_s5 + $0x8] sm:$0xff] }
   0xd   :  { %71 = vmatpush.msra.mxu0 %v44_v6  ;;  %138 = vmatpush.msra.mxu2 %v120_v14  ;;  %v175_v18 = vld [vmem:[%s342_s2] ss:$0 sm:$0xff] }
   0xe   :  { %168 = vmatmul.msk.f32.vlgmr.msra.gmra.mxu0 %vm52_vm0, %v43_v7  ;;  %104 = vmatpush.msra.mxu1 %v81_v8  ;;  %v114_v24 = vld [vmem:[%s345_s5] sm:$0xff] }
   0xf   :  { %139 = vmatpush.msra.mxu2 %v119_v15  ;;  %v176_v25 = vld [vmem:[%s344_s4] ss:$0 sm:$0xff] }
  0x10   :  { %105 = vmatpush.msra.mxu1 %v80_v9  ;;  %v177_v29 = vld [vmem:[%s346_s6] ss:$0 sm:$0xff] }
  0x11   :  { %140 = vmatpush.msra.mxu2 %v118_v16 }
  0x12   :  { %106 = vmatpush.msra.mxu1 %v79_v10 }
  0x13   :  { %141 = vmatpush.msra.mxu2 %v117_v17 }
  0x14   :  { %107 = vmatpush.msra.mxu1 %v78_v11 }
  0x15   :  { %142 = vmatpush.msra.mxu2 %v116_v22 }
  0x16   :  { %108 = vmatpush.msra.mxu1 %v77_v12 }
  0x17   :  { %143 = vmatpush.msra.mxu2 %v115_v23 }
  0x19   :  { %144 = vmatpush.msra.mxu2 %v114_v24 }
  0x8b   :  { %v73_v19 = vpop.f32.mrf.mxu0 }
  0x8c   :  { %v74_v20 = vadd.f32 %v175_v18, %v73_v19 }
  0x8e   :  { %v76_v21 = vmax.f32 %v74_v20, 0.0 }
  0x90   :  { %169 = vmatmul.msk.f32.vlgmr.msra.gmra.mxu1 %vm89_vm1, %v76_v21 }
 0x10d   :  { %v110_v26 = vpop.f32.mrf.mxu1 }
 0x10e   :  { %v111_v27 = vadd.f32 %v176_v25, %v110_v26 }
 0x110   :  { %v113_v28 = vmax.f32 %v111_v27, 0.0 }
 0x112   :  { %170 = vmatmul.msk.f32.vlgmr.msra.gmra.mxu2 %vm89_vm1, %v113_v28 }
 0x195   :  { %v146_v30 = vpop.f32.mrf.mxu2 }
 0x196   :  { %v147_v31 = vadd.f32 %v177_v29, %v146_v30 }
 0x198   :  { %150 = vst.msk [vmem:[#allocation5] sm:$0xff] %vm149_vm2, %v147_v31 }
 0x199   :  { %161 = dma.vmem_to_hbm [thread:$0]  %s157_s0, 128, %s159_s23, [#allocation4]  }
 0x19a   :  { %228 = dma.done.wait [#allocation4], 128  }
 0x19b   :  { %229 = vsyncadd [#allocation4], 4294967168 }
 0x19c   :  { %166 = vsyncpa [#allocation3], 1 }
 0x19d   :  { %167 = vsyncpa [#allocation4], 1 }

</bundles_post_ra>
